<compile_context>
chip_gen: v7x
topology: tpu7x:2x2x1
jax: 0.10.0
libtpu: 0.0.40
codegen_flags: <defaults>
</compile_context>

<pallas_src>
import math
import jax
import jax.numpy as jnp
from jax.experimental import pallas as pl
from jax.experimental.pallas import tpu as pltpu


_LANE = 128
_SUBLANE = 8
# Conservative double-buffered VMEM budget that fits every generation's
# default scoped-VMEM window (v5e: 16 MiB, v6e/v7x: 32 MiB).
_VMEM_BUDGET_BYTES = 12 * 1024 * 1024


def _make_sum_kernel(n_inputs):
    """Elementwise sum of n_inputs same-shaped tiles, f32 accumulation."""

    def kernel(*refs):
        in_refs = refs[:n_inputs]
        o_ref = refs[n_inputs]
        acc = in_refs[0][...].astype(jnp.float32)
        for r in in_refs[1:]:
            acc = acc + r[...].astype(jnp.float32)
        o_ref[...] = acc.astype(o_ref.dtype)

    return kernel


def _slab_geometry(total):
    """Pick a lane-dense (rows, width, pad) factorization of `total` elements."""
    for w in (4096, 2048, 1024, 512, 256, 128):
        if total % w == 0:
            return total // w, w, 0
    # Ragged element count (rare): pad flat inputs up to a 1024-wide slab.
    width = 8 * _LANE
    padded = pl.cdiv(total, width) * width
    return padded // width, width, padded - total


def _elementwise_sum(args):
    """Elementwise sum of same-shaped arrays via one Pallas pass."""
    n = len(args)
    shape = args[0].shape
    dtype = args[0].dtype
    total = math.prod(shape) if shape else 1

    rows, width, pad = _slab_geometry(total)

    flats = [jnp.ravel(a) for a in args]
    if pad:
        # Zero pad is sum-neutral; only hit when total % 128 != 0.
        flats = [jnp.pad(f, (0, pad)) for f in flats]
    slabs = [f.reshape(rows, width) for f in flats]

    itemsize = jnp.dtype(dtype).itemsize
    # n input slabs + 1 output slab, each double-buffered by the pipeline.
    live_bufs = 2 * (n + 1)
    cap = _VMEM_BUDGET_BYTES // (live_bufs * width * itemsize)
    cap = max(_SUBLANE, (cap // _SUBLANE) * _SUBLANE)
    block_rows = rows if rows <= cap else cap
    grid = (pl.cdiv(rows, block_rows),)

    spec = pl.BlockSpec((block_rows, width), lambda i: (i, 0))

    out = pl.pallas_call(
        _make_sum_kernel(n),
        out_shape=jax.ShapeDtypeStruct((rows, width), dtype),
        grid_spec=pltpu.PrefetchScalarGridSpec(
            num_scalar_prefetch=0,
            grid=grid,
            in_specs=[spec] * n,
            out_specs=spec,
        ),
        compiler_params=pltpu.CompilerParams(
            dimension_semantics=("parallel",)),
        # Output slab matches input-0 slab exactly: let XLA reuse the buffer.
        input_output_aliases={0: 0},
        cost_estimate=pl.CostEstimate(
            flops=(n - 1) * total,
            transcendentals=0,
            bytes_accessed=(n + 1) * total * itemsize),
    )(*slabs)

    out_flat = out.reshape(-1)
    if pad:
        out_flat = out_flat[:total]
    return out_flat.reshape(shape)


def sum_layer(*args, dim=0):
    """Pallas-backed equivalent of SumLayer.forward.

    torch.sum over the tuple/list of same-shaped tensors, i.e.
    jnp.sum(jnp.stack(args, axis=0), axis=dim). dim=0 (the module default)
    is the elementwise sum across the inputs and runs in the Pallas kernel.
    """
    assert len(args) > 0, "Empty args for sum is invalid"
    if len(args) == 1 and isinstance(args[0], (list, tuple)):
        args = tuple(args[0])
    args = tuple(jnp.asarray(a) for a in args)
    base_shape = args[0].shape
    assert all(a.shape == base_shape for a in args), "all inputs must share a shape"

    if dim == 0:
        return _elementwise_sum(args)
    # TODO(synk): dim != 0 reduces inside each tensor (not across the list);
    # falling back to plain JAX rather than a dedicated Pallas reduction kernel.
    return jnp.sum(jnp.stack(args, axis=0), axis=dim)


if __name__ == "__main__":
    key = jax.random.PRNGKey(0)
    k1, k2, k3 = jax.random.split(key, 3)
    shape = (2, 4, 16, 16)
    x1 = jax.random.normal(k1, shape, dtype=jnp.float32)
    x2 = jax.random.normal(k2, shape, dtype=jnp.float32)
    x3 = jax.random.normal(k3, shape, dtype=jnp.float32)

    # SumLayer(dim=0)(x1, x2, x3)
    fn = jax.jit(lambda a, b, c: sum_layer(a, b, c, dim=0))
    out = jax.block_until_ready(fn(x1, x2, x3))

    ref = x1 + x2 + x3  # == torch.sum(stack([x1, x2, x3]), dim=0)
    assert out.shape == ref.shape
    assert out.dtype == ref.dtype
    assert bool(jnp.allclose(out, ref, rtol=1e-6, atol=1e-6))

    # List-argument path of SumLayer.forward: forward([x1, x2, x3])
    out_list = jax.block_until_ready(sum_layer([x1, x2, x3]))
    assert bool(jnp.allclose(out_list, ref, rtol=1e-6, atol=1e-6))

    print("KERNEL_OK")
</pallas_src>

<mosaic_0001>
module attributes {stable_mosaic.version = 11 : i64} {
  func.func @kernel(%arg0: i32, %arg1: memref<1x2048xf32, #tpu.memory_space<vmem>>, %arg2: memref<1x2048xf32, #tpu.memory_space<vmem>>, %arg3: memref<1x2048xf32, #tpu.memory_space<vmem>>, %arg4: memref<1x2048xf32, #tpu.memory_space<vmem>>) attributes {dimension_semantics = [#tpu.dimension_semantics<parallel>], iteration_bounds = array<i64: 1>, scalar_prefetch = 0 : i64, scratch_operands = 0 : i64, tpu.core_type = #tpu.core_type<tc>, window_params = [{transform_indices = @transform_0, window_bounds = array<i64: 1, 2048>}, {transform_indices = @transform_1, window_bounds = array<i64: 1, 2048>}, {transform_indices = @transform_2, window_bounds = array<i64: 1, 2048>}, {transform_indices = @transform_3, window_bounds = array<i64: 1, 2048>}]} {
    %c0 = arith.constant 0 : index
    %c0_0 = arith.constant 0 : index
    %0 = vector.load %arg1[%c0, %c0_0] : memref<1x2048xf32, #tpu.memory_space<vmem>>, vector<1x2048xf32>
    %c0_1 = arith.constant 0 : index
    %c0_2 = arith.constant 0 : index
    %1 = vector.load %arg2[%c0_1, %c0_2] : memref<1x2048xf32, #tpu.memory_space<vmem>>, vector<1x2048xf32>
    %2 = arith.addf %0, %1 : vector<1x2048xf32>
    %c0_3 = arith.constant 0 : index
    %c0_4 = arith.constant 0 : index
    %3 = vector.load %arg3[%c0_3, %c0_4] : memref<1x2048xf32, #tpu.memory_space<vmem>>, vector<1x2048xf32>
    %4 = arith.addf %2, %3 : vector<1x2048xf32>
    %c0_5 = arith.constant 0 : index
    %c0_6 = arith.constant 0 : index
    %5 = vector.load %arg4[%c0_5, %c0_6] : memref<1x2048xf32, #tpu.memory_space<vmem>>, vector<1x2048xf32>
    tpu.vector_store %arg4[%c0_5, %c0_6], %4 {strides = array<i32>} : memref<1x2048xf32, #tpu.memory_space<vmem>>, vector<1x2048xf32>,
    return
  }
  func.func @transform_0(%arg0: i32) -> (i32, i32) {
    %c0_i32 = arith.constant 0 : i32
    %c0_i32_0 = arith.constant 0 : i32
    return %arg0, %c0_i32 : i32, i32
  }
  func.func @transform_1(%arg0: i32) -> (i32, i32) {
    %c0_i32 = arith.constant 0 : i32
    %c0_i32_0 = arith.constant 0 : i32
    return %arg0, %c0_i32 : i32, i32
  }
  func.func @transform_2(%arg0: i32) -> (i32, i32) {
    %c0_i32 = arith.constant 0 : i32
    %c0_i32_0 = arith.constant 0 : i32
    return %arg0, %c0_i32 : i32, i32
  }
  func.func @transform_3(%arg0: i32) -> (i32, i32) {
    %c0_i32 = arith.constant 0 : i32
    %c0_i32_0 = arith.constant 0 : i32
    return %arg0, %c0_i32 : i32, i32
  }
}

</mosaic_0001>

<bundles_post_ra>
// kernel: _lambda_.1
= control target key start
LH: loop header
LB: loop body
LE: loop exit
PB: predicated region body
PF: predicated region fallthrough
CT: control target
= control target key end

     0   :  { %s74_s0 = inlined_call_operand.vmem [shape: f32[1,2048], index: 0, kind: input, shape index: {}, may-alias: {0,3}]   ;;  %s75_s1 = inlined_call_operand.vmem [shape: f32[1,2048], index: 1, kind: input, shape index: {}]   ;;  %s76_s2 = inlined_call_operand.vmem [shape: f32[1,2048], index: 2, kind: input, shape index: {}]   ;;  %s77_s3 = inlined_call_operand.vmem [shape: f32[1,2048], index: 3, kind: output, shape index: {}, may-alias: {0,3}]  }
   0x1   :  { %v14_v0 = vld [vmem:[%s74_s0] sm:$0xff]  ;;  %v15_v4 = vld [vmem:[%s74_s0 + $0x8] sm:$0xff] }
   0x2   :  { %v16_v1 = vld [vmem:[%s75_s1] sm:$0xff]  ;;  %v17_v5 = vld [vmem:[%s75_s1 + $0x8] sm:$0xff] }
   0x3   :  { %v20_v2 = vld [vmem:[%s76_s2] sm:$0xff]  ;;  %v18_v3 = vadd.f32 %v16_v1, %v14_v0  ;;  %v21_v6 = vld [vmem:[%s76_s2 + $0x8] sm:$0xff]  ;;  %v19_v7 = vadd.f32 %v17_v5, %v15_v4 }
   0x5   :  { %v22_v8 = vadd.f32 %v20_v2, %v18_v3  ;;  %v23_v9 = vadd.f32 %v21_v6, %v19_v7 }
   0x7   :  { %24 = vst [vmem:[%s77_s3] sm:$0xff] %v22_v8  ;;  %25 = vst [vmem:[%s77_s3 + $0x8] sm:$0xff] %v23_v9 }

</bundles_post_ra>
